<compile_context>
chip_gen: v6e
topology: v6e:2x2x1
jax: 0.10.0
libtpu: 0.0.40
codegen_flags: <defaults>
</compile_context>

<pallas_src>
import functools

import jax
import jax.numpy as jnp
from jax.experimental import pallas as pl
from jax.experimental.pallas import tpu as pltpu

LANE = 128
SUBLANE_BF16 = 16  # bf16 sublane packing -> batch tile multiple of 16


def _round_up(n, m):
    return ((n + m - 1) // m) * m


def _vmem_budget_bytes():
    """Per-kernel VMEM limit: physical capacity minus compiler-scratch headroom."""
    cap = 64 * 1024 * 1024  # conservative default = v7x per-TC VMEM
    try:
        cap = int(pltpu.get_tpu_info().vmem_capacity_bytes)
    except Exception:
        pass  # older jax / interpret mode: keep conservative default
    return (cap * 3) // 4  # ~48 MiB on v7x, ~96 MiB on v5e/v6e


# --------------------------------------------------------------------------- #
# Kernel
# --------------------------------------------------------------------------- #
def _vae_kernel(
    x_ref, h_ref, eps_ref,
    we1_ref, be1_ref,
    wml_ref, bml_ref,
    wd1_ref, bd1_ref,
    wd2_ref, bd2_ref,
    recons_ref, mu_ref, logvar_ref,
    *, z_p,
):
    # ---------------- Encoder ----------------
    # x is streamed pre-cast to bf16; accumulate in f32, keep epilogue in f32.
    h_enc = (
        jnp.dot(x_ref[...], we1_ref[...], preferred_element_type=jnp.float32)
        + be1_ref[...]
    )
    h_enc = jnp.maximum(h_enc, 0.0)  # ReLU

    # Fused mu/logVar head: one 2*z_p-wide matmul, split at a 128-aligned column.
    ml = (
        jnp.dot(h_enc.astype(jnp.bfloat16), wml_ref[...],
                preferred_element_type=jnp.float32)
        + bml_ref[...]
    )
    mu = ml[:, :z_p]
    logvar = ml[:, z_p:]

    # Reparameterization (f32): z = mu + exp(0.5 * logVar) * eps
    z = mu + jnp.exp(0.5 * logvar) * eps_ref[...]

    # ---------------- Decoder ----------------
    # z_h = concat([z, h.repeat(1, 200)]); the 200x repeat is folded into the
    # decoder weight in prepare_params, so the kernel only concatenates [z, h]
    # along the lane axis (both 128-padded => no tile-boundary crossing) and
    # issues a single 256-deep matmul.
    zh = jnp.concatenate([z.astype(jnp.bfloat16), h_ref[...]], axis=1)
    h_dec = (
        jnp.dot(zh, wd1_ref[...], preferred_element_type=jnp.float32)
        + bd1_ref[...]
    )
    h_dec = jnp.maximum(h_dec, 0.0)  # ReLU

    out = (
        jnp.dot(h_dec.astype(jnp.bfloat16), wd2_ref[...],
                preferred_element_type=jnp.float32)
        + bd2_ref[...]
    )
    recons_ref[...] = jax.nn.sigmoid(out)
    mu_ref[...] = mu
    logvar_ref[...] = logvar


# --------------------------------------------------------------------------- #
# One-time weight preparation (fold / pad / fuse / cast) — NOT in the per-call path
# --------------------------------------------------------------------------- #
def prepare_params(params, repeat=200):
    (we1, be1, wmu, bmu, wlv, blv, wdz, wdh, bd1, wd2, bd2) = params
    x_dim, enc_h = we1.shape
    z_dim = wmu.shape[1]
    h_dim = wdh.shape[0] // repeat
    dec_h = wd2.shape[0]

    x_p = _round_up(x_dim, LANE)
    e_p = _round_up(enc_h, LANE)
    z_p = _round_up(z_dim, LANE)
    h_p = _round_up(h_dim, LANE)
    d_p = _round_up(dec_h, LANE)

    def pad2(a, r, c):
        return jnp.pad(a, ((0, r - a.shape[0]), (0, c - a.shape[1])))

    # Fold the 200x h-repeat into the decoder weight (exact; f32 accumulation,
    # single cast to bf16 afterwards).
    wdh_f = wdh.reshape(repeat, h_dim, dec_h).sum(axis=0)

    we1_p = pad2(we1, x_p, e_p).astype(jnp.bfloat16)
    be1_p = pad2(be1, 1, e_p)

    # Fused mu/logVar projection weight: (e_p, 2*z_p).
    wml_p = jnp.concatenate(
        [pad2(wmu, e_p, z_p), pad2(wlv, e_p, z_p)], axis=1
    ).astype(jnp.bfloat16)
    bml_p = jnp.concatenate([pad2(bmu, 1, z_p), pad2(blv, 1, z_p)], axis=1)

    # Fused decoder layer-1 weight for concat([z, h]): (z_p + h_p, d_p).
    wd1_p = jnp.concatenate(
        [pad2(wdz, z_p, d_p), pad2(wdh_f, h_p, d_p)], axis=0
    ).astype(jnp.bfloat16)
    bd1_p = pad2(bd1, 1, d_p)

    wd2_p = pad2(wd2, d_p, x_p).astype(jnp.bfloat16)
    bd2_p = pad2(bd2, 1, x_p)

    return (we1_p, be1_p, wml_p, bml_p, wd1_p, bd1_p, wd2_p, bd2_p)


# --------------------------------------------------------------------------- #
# Forward wrapper
# --------------------------------------------------------------------------- #
@jax.jit
def vae_forward(x, h, eps, prepared):
    """x: (B, x_dim), h: (B, h_dim), eps: (B, z_dim); prepared = prepare_params(...)."""
    (we1_p, be1_p, wml_p, bml_p, wd1_p, bd1_p, wd2_p, bd2_p) = prepared

    B, x_dim = x.shape
    h_dim = h.shape[1]
    z_dim = eps.shape[1]

    # Padded feature dims (static, derived from the prepared weights).
    x_p, e_p = we1_p.shape
    z_p = wml_p.shape[1] // 2
    h_p = wd1_p.shape[0] - z_p
    d_p = wd2_p.shape[0]

    # ----- batch tile sized from VMEM budget (weights resident, single-buffered) -----
    vmem_budget = _vmem_budget_bytes()
    weight_bytes = sum(int(a.size) * a.dtype.itemsize for a in prepared)
    headroom = 4 * 1024 * 1024
    # Streamed per-row bytes (inputs bf16/f32 + f32 outputs), x2 for double buffering.
    row_bytes = 2 * (2 * (x_p + h_p) + 4 * z_p + 4 * (x_p + 2 * z_p))
    max_rows = max(SUBLANE_BF16, (vmem_budget - weight_bytes - headroom) // row_bytes)

    tile_b = int(min(512, max_rows, _round_up(B, SUBLANE_BF16)))
    tile_b = max(SUBLANE_BF16, (tile_b // SUBLANE_BF16) * SUBLANE_BF16)
    # Prefer >= 2 grid steps so the "parallel" batch axis can shard across both
    # v7x TensorCores (no-op for tiny demo batches).
    if tile_b >= _round_up(B, SUBLANE_BF16) and B > SUBLANE_BF16:
        tile_b = _round_up((B + 1) // 2, SUBLANE_BF16)

    b_p = _round_up(B, tile_b)
    grid = (b_p // tile_b,)

    # ----- activation streams: bf16 for x/h (halves HBM read bytes), f32 for eps -----
    def pad_act(a, rows, cols, dtype):
        a = jnp.pad(a, ((0, rows - a.shape[0]), (0, cols - a.shape[1])))
        return a.astype(dtype)

    xp = pad_act(x, b_p, x_p, jnp.bfloat16)
    hp = pad_act(h, b_p, h_p, jnp.bfloat16)
    epsp = pad_act(eps, b_p, z_p, jnp.float32)

    def batched(dim):
        return pl.BlockSpec((tile_b, dim), lambda i: (i, 0))

    # Un-gridded, whole-array VMEM residents: copied once, not double-buffered.
    resident = pl.BlockSpec(memory_space=pltpu.MemorySpace.VMEM)

    in_specs = [batched(x_p), batched(h_p), batched(z_p)] + [resident] * 8

    out_shapes = (
        jax.ShapeDtypeStruct((b_p, x_p), jnp.float32),  # recons
        jax.ShapeDtypeStruct((b_p, z_p), jnp.float32),  # mu
        jax.ShapeDtypeStruct((b_p, z_p), jnp.float32),  # logVar
    )
    out_specs = [batched(x_p), batched(z_p), batched(z_p)]

    recons_p, mu_p, logvar_p = pl.pallas_call(
        functools.partial(_vae_kernel, z_p=z_p),
        grid=grid,
        in_specs=in_specs,
        out_specs=out_specs,
        out_shape=out_shapes,
        compiler_params=pltpu.CompilerParams(
            dimension_semantics=("parallel",),      # megacore sharding over batch
            vmem_limit_bytes=int(vmem_budget),      # derived per generation, w/ headroom
        ),
    )(xp, hp, epsp, we1_p, be1_p, wml_p, bml_p, wd1_p, bd1_p, wd2_p, bd2_p)

    return (
        recons_p[:B, :x_dim],
        mu_p[:B, :z_dim],
        logvar_p[:B, :z_dim],
    )


# --------------------------------------------------------------------------- #
# Pure-JAX reference and init
# --------------------------------------------------------------------------- #
def vae_reference(x, h, eps, params):
    """Pure-JAX f32 reference matching the PyTorch forward exactly."""
    (we1, be1, wmu, bmu, wlv, blv, wdz, wdh, bd1, wd2, bd2) = params
    h_enc = jnp.maximum(x @ we1 + be1, 0.0)
    mu = h_enc @ wmu + bmu
    logvar = h_enc @ wlv + blv
    z = mu + jnp.exp(0.5 * logvar) * eps
    h_rep = jnp.tile(h, (1, 200))
    z_h = jnp.concatenate([z, h_rep], axis=1)
    w1 = jnp.concatenate([wdz, wdh], axis=0)
    h_dec = jnp.maximum(z_h @ w1 + bd1, 0.0)
    return jax.nn.sigmoid(h_dec @ wd2 + bd2), mu, logvar


def init_params(key, x_dim, enc_h, z_dim, h_dim, dec_h):
    """Deterministic PyTorch-style (U[-1/sqrt(fan_in), 1/sqrt(fan_in)]) init."""
    ks = jax.random.split(key, 11)

    def lin(k, fan_in, fan_out):
        bound = 1.0 / jnp.sqrt(fan_in)
        return jax.random.uniform(
            k, (fan_in, fan_out), jnp.float32, minval=-bound, maxval=bound
        )

    def bias(k, fan_in, fan_out):
        bound = 1.0 / jnp.sqrt(fan_in)
        return jax.random.uniform(
            k, (1, fan_out), jnp.float32, minval=-bound, maxval=bound
        )

    zh_dim = z_dim + 200 * h_dim
    we1 = lin(ks[0], x_dim, enc_h)
    be1 = bias(ks[1], x_dim, enc_h)
    wmu = lin(ks[2], enc_h, z_dim)
    bmu = bias(ks[3], enc_h, z_dim)
    wlv = lin(ks[4], enc_h, z_dim)
    blv = bias(ks[5], enc_h, z_dim)
    wd1 = lin(ks[6], zh_dim, dec_h)
    wdz = wd1[:z_dim, :]
    wdh = wd1[z_dim:, :]
    bd1 = bias(ks[7], zh_dim, dec_h)
    wd2 = lin(ks[8], dec_h, x_dim)
    bd2 = bias(ks[9], dec_h, x_dim)
    return (we1, be1, wmu, bmu, wlv, blv, wdz, wdh, bd1, wd2, bd2)


if __name__ == "__main__":
    B, X_DIM, ENC_H, Z_DIM, H_DIM, DEC_H = 4, 64, 32, 16, 1, 32

    key = jax.random.PRNGKey(0)
    k_x, k_h, k_eps, k_p = jax.random.split(key, 4)

    x = jax.random.normal(k_x, (B, X_DIM), jnp.float32)
    h = jax.random.normal(k_h, (B, H_DIM), jnp.float32)
    # TODO(synk): torch.randn reparameterization noise is supplied as a
    # deterministic eps input rather than sampled in-kernel (bit-exact parity).
    eps = jax.random.normal(k_eps, (B, Z_DIM), jnp.float32)

    params = init_params(k_p, X_DIM, ENC_H, Z_DIM, H_DIM, DEC_H)
    prepared = prepare_params(params)          # one-time fold / pad / fuse / cast
    jax.block_until_ready(prepared)

    recons, mu, logvar = vae_forward(x, h, eps, prepared)
    jax.block_until_ready((recons, mu, logvar))

    assert recons.shape == (B, X_DIM)
    assert mu.shape == (B, Z_DIM)
    assert logvar.shape == (B, Z_DIM)
    assert bool(jnp.all(jnp.isfinite(recons)))

    # Correctness vs. pure-JAX f32 reference (bf16 matmul operands/activation
    # streams => loose tolerance).
    r_ref, mu_ref, lv_ref = vae_reference(x, h, eps, params)
    assert bool(jnp.allclose(recons, r_ref, atol=3e-2, rtol=3e-2))
    assert bool(jnp.allclose(mu, mu_ref, atol=3e-2, rtol=3e-2))
    assert bool(jnp.allclose(logvar, lv_ref, atol=3e-2, rtol=3e-2))

    print("KERNEL_OK")
</pallas_src>

<mosaic_0001>
module attributes {stable_mosaic.version = 11 : i64} {
  func.func @_vae_kernel(%arg0: i32, %arg1: memref<16x128xbf16, #tpu.memory_space<vmem>>, %arg2: memref<16x128xbf16, #tpu.memory_space<vmem>>, %arg3: memref<16x128xf32, #tpu.memory_space<vmem>>, %arg4: memref<128x128xbf16, #tpu.memory_space<vmem>>, %arg5: memref<1x128xf32, #tpu.memory_space<vmem>>, %arg6: memref<128x256xbf16, #tpu.memory_space<vmem>>, %arg7: memref<1x256xf32, #tpu.memory_space<vmem>>, %arg8: memref<256x128xbf16, #tpu.memory_space<vmem>>, %arg9: memref<1x128xf32, #tpu.memory_space<vmem>>, %arg10: memref<128x128xbf16, #tpu.memory_space<vmem>>, %arg11: memref<1x128xf32, #tpu.memory_space<vmem>>, %arg12: memref<16x128xf32, #tpu.memory_space<vmem>>, %arg13: memref<16x128xf32, #tpu.memory_space<vmem>>, %arg14: memref<16x128xf32, #tpu.memory_space<vmem>>) attributes {dimension_semantics = [#tpu.dimension_semantics<parallel>], iteration_bounds = array<i64: 1>, scalar_prefetch = 0 : i64, scratch_operands = 0 : i64, tpu.core_type = #tpu.core_type<tc>, window_params = [{transform_indices = @transform_0, window_bounds = array<i64: 16, 128>}, {transform_indices = @transform_1, window_bounds = array<i64: 16, 128>}, {transform_indices = @transform_2, window_bounds = array<i64: 16, 128>}, {pipeline_mode = #tpu.pipeline_mode<synchronous>, transform_indices = @transform_3, window_bounds = array<i64: 128, 128>}, {pipeline_mode = #tpu.pipeline_mode<synchronous>, transform_indices = @transform_4, window_bounds = array<i64: 1, 128>}, {pipeline_mode = #tpu.pipeline_mode<synchronous>, transform_indices = @transform_5, window_bounds = array<i64: 128, 256>}, {pipeline_mode = #tpu.pipeline_mode<synchronous>, transform_indices = @transform_6, window_bounds = array<i64: 1, 256>}, {pipeline_mode = #tpu.pipeline_mode<synchronous>, transform_indices = @transform_7, window_bounds = array<i64: 256, 128>}, {pipeline_mode = #tpu.pipeline_mode<synchronous>, transform_indices = @transform_8, window_bounds = array<i64: 1, 128>}, {pipeline_mode = #tpu.pipeline_mode<synchronous>, transform_indices = @transform_9, window_bounds = array<i64: 128, 128>}, {pipeline_mode = #tpu.pipeline_mode<synchronous>, transform_indices = @transform_10, window_bounds = array<i64: 1, 128>}, {transform_indices = @transform_11, window_bounds = array<i64: 16, 128>}, {transform_indices = @transform_12, window_bounds = array<i64: 16, 128>}, {transform_indices = @transform_13, window_bounds = array<i64: 16, 128>}]} {
    %c0 = arith.constant 0 : index
    %c0_0 = arith.constant 0 : index
    %0 = vector.load %arg1[%c0, %c0_0] : memref<16x128xbf16, #tpu.memory_space<vmem>>, vector<16x128xbf16>
    %c0_1 = arith.constant 0 : index
    %c0_2 = arith.constant 0 : index
    %1 = vector.load %arg4[%c0_1, %c0_2] : memref<128x128xbf16, #tpu.memory_space<vmem>>, vector<128x128xbf16>
    %cst = arith.constant dense<0.000000e+00> : vector<16x128xf32>
    %2 = tpu.matmul %0, %1, %cst {dimension_numbers = #tpu.dot_dimension_numbers<[1], [0], [0], [1], [0, 0, 1, 1], [], []>} : vector<16x128xbf16>, vector<128x128xbf16>, vector<16x128xf32> -> vector<16x128xf32>
    %c0_3 = arith.constant 0 : index
    %c0_4 = arith.constant 0 : index
    %3 = vector.load %arg5[%c0_3, %c0_4] : memref<1x128xf32, #tpu.memory_space<vmem>>, vector<1x128xf32>
    %4 = vector.broadcast %3 : vector<1x128xf32> to vector<16x128xf32>
    %5 = arith.addf %2, %4 : vector<16x128xf32>
    %cst_5 = arith.constant 0.000000e+00 : f32
    %6 = vector.broadcast %cst_5 : f32 to vector<16x128xf32>
    %7 = arith.maximumf %5, %6 : vector<16x128xf32>
    %8 = arith.truncf %7 : vector<16x128xf32> to vector<16x128xbf16>
    %c0_6 = arith.constant 0 : index
    %c0_7 = arith.constant 0 : index
    %9 = vector.load %arg6[%c0_6, %c0_7] : memref<128x256xbf16, #tpu.memory_space<vmem>>, vector<128x256xbf16>
    %cst_8 = arith.constant dense<0.000000e+00> : vector<16x256xf32>
    %10 = tpu.matmul %8, %9, %cst_8 {dimension_numbers = #tpu.dot_dimension_numbers<[1], [0], [0], [1], [0, 0, 1, 1], [], []>} : vector<16x128xbf16>, vector<128x256xbf16>, vector<16x256xf32> -> vector<16x256xf32>
    %c0_9 = arith.constant 0 : index
    %c0_10 = arith.constant 0 : index
    %11 = vector.load %arg7[%c0_9, %c0_10] : memref<1x256xf32, #tpu.memory_space<vmem>>, vector<1x256xf32>
    %12 = vector.broadcast %11 : vector<1x256xf32> to vector<16x256xf32>
    %13 = arith.addf %10, %12 : vector<16x256xf32>
    %14 = vector.extract_strided_slice %13 {offsets = [0, 0], sizes = [16, 128], strides = [1, 1]} : vector<16x256xf32> to vector<16x128xf32>
    %15 = vector.extract_strided_slice %13 {offsets = [0, 128], sizes = [16, 128], strides = [1, 1]} : vector<16x256xf32> to vector<16x128xf32>
    %cst_11 = arith.constant 5.000000e-01 : f32
    %16 = vector.broadcast %cst_11 : f32 to vector<16x128xf32>
    %17 = arith.mulf %16, %15 : vector<16x128xf32>
    %18 = math.exp %17 : vector<16x128xf32>
    %c0_12 = arith.constant 0 : index
    %c0_13 = arith.constant 0 : index
    %19 = vector.load %arg3[%c0_12, %c0_13] : memref<16x128xf32, #tpu.memory_space<vmem>>, vector<16x128xf32>
    %20 = arith.mulf %18, %19 : vector<16x128xf32>
    %21 = arith.addf %14, %20 : vector<16x128xf32>
    %22 = arith.truncf %21 : vector<16x128xf32> to vector<16x128xbf16>
    %c0_14 = arith.constant 0 : index
    %c0_15 = arith.constant 0 : index
    %23 = vector.load %arg2[%c0_14, %c0_15] : memref<16x128xbf16, #tpu.memory_space<vmem>>, vector<16x128xbf16>
    %24 = tpu.concatenate %22, %23 in 1 : vector<16x128xbf16>, vector<16x128xbf16> -> vector<16x256xbf16>
    %c0_16 = arith.constant 0 : index
    %c0_17 = arith.constant 0 : index
    %25 = vector.load %arg8[%c0_16, %c0_17] : memref<256x128xbf16, #tpu.memory_space<vmem>>, vector<256x128xbf16>
    %cst_18 = arith.constant dense<0.000000e+00> : vector<16x128xf32>
    %26 = tpu.matmul %24, %25, %cst_18 {dimension_numbers = #tpu.dot_dimension_numbers<[1], [0], [0], [1], [0, 0, 1, 1], [], []>} : vector<16x256xbf16>, vector<256x128xbf16>, vector<16x128xf32> -> vector<16x128xf32>
    %c0_19 = arith.constant 0 : index
    %c0_20 = arith.constant 0 : index
    %27 = vector.load %arg9[%c0_19, %c0_20] : memref<1x128xf32, #tpu.memory_space<vmem>>, vector<1x128xf32>
    %28 = vector.broadcast %27 : vector<1x128xf32> to vector<16x128xf32>
    %29 = arith.addf %26, %28 : vector<16x128xf32>
    %cst_21 = arith.constant 0.000000e+00 : f32
    %30 = vector.broadcast %cst_21 : f32 to vector<16x128xf32>
    %31 = arith.maximumf %29, %30 : vector<16x128xf32>
    %32 = arith.truncf %31 : vector<16x128xf32> to vector<16x128xbf16>
    %c0_22 = arith.constant 0 : index
    %c0_23 = arith.constant 0 : index
    %33 = vector.load %arg10[%c0_22, %c0_23] : memref<128x128xbf16, #tpu.memory_space<vmem>>, vector<128x128xbf16>
    %cst_24 = arith.constant dense<0.000000e+00> : vector<16x128xf32>
    %34 = tpu.matmul %32, %33, %cst_24 {dimension_numbers = #tpu.dot_dimension_numbers<[1], [0], [0], [1], [0, 0, 1, 1], [], []>} : vector<16x128xbf16>, vector<128x128xbf16>, vector<16x128xf32> -> vector<16x128xf32>
    %c0_25 = arith.constant 0 : index
    %c0_26 = arith.constant 0 : index
    %35 = vector.load %arg11[%c0_25, %c0_26] : memref<1x128xf32, #tpu.memory_space<vmem>>, vector<1x128xf32>
    %36 = vector.broadcast %35 : vector<1x128xf32> to vector<16x128xf32>
    %37 = arith.addf %34, %36 : vector<16x128xf32>
    %38 = arith.negf %37 : vector<16x128xf32>
    %39 = math.exp %38 : vector<16x128xf32>
    %cst_27 = arith.constant 1.000000e+00 : f32
    %40 = vector.broadcast %cst_27 : f32 to vector<16x128xf32>
    %41 = arith.addf %40, %39 : vector<16x128xf32>
    %42 = arith.divf %40, %41 : vector<16x128xf32>
    %c0_28 = arith.constant 0 : index
    %c0_29 = arith.constant 0 : index
    %43 = vector.load %arg12[%c0_28, %c0_29] : memref<16x128xf32, #tpu.memory_space<vmem>>, vector<16x128xf32>
    tpu.vector_store %arg12[%c0_28, %c0_29], %42 {strides = array<i32>} : memref<16x128xf32, #tpu.memory_space<vmem>>, vector<16x128xf32>,
    %c0_30 = arith.constant 0 : index
    %c0_31 = arith.constant 0 : index
    %44 = vector.load %arg13[%c0_30, %c0_31] : memref<16x128xf32, #tpu.memory_space<vmem>>, vector<16x128xf32>
    tpu.vector_store %arg13[%c0_30, %c0_31], %14 {strides = array<i32>} : memref<16x128xf32, #tpu.memory_space<vmem>>, vector<16x128xf32>,
    %c0_32 = arith.constant 0 : index
    %c0_33 = arith.constant 0 : index
    %45 = vector.load %arg14[%c0_32, %c0_33] : memref<16x128xf32, #tpu.memory_space<vmem>>, vector<16x128xf32>
    tpu.vector_store %arg14[%c0_32, %c0_33], %15 {strides = array<i32>} : memref<16x128xf32, #tpu.memory_space<vmem>>, vector<16x128xf32>,
    return
  }
  func.func @transform_0(%arg0: i32) -> (i32, i32) {
    %c0_i32 = arith.constant 0 : i32
    %c0_i32_0 = arith.constant 0 : i32
    return %arg0, %c0_i32 : i32, i32
  }
  func.func @transform_1(%arg0: i32) -> (i32, i32) {
    %c0_i32 = arith.constant 0 : i32
    %c0_i32_0 = arith.constant 0 : i32
    return %arg0, %c0_i32 : i32, i32
  }
  func.func @transform_2(%arg0: i32) -> (i32, i32) {
    %c0_i32 = arith.constant 0 : i32
    %c0_i32_0 = arith.constant 0 : i32
    return %arg0, %c0_i32 : i32, i32
  }
  func.func @transform_3(%arg0: i32) -> (i32, i32) {
    %c0_i32 = arith.constant 0 : i32
    %c0_i32_0 = arith.constant 0 : i32
    %c0_i32_1 = arith.constant 0 : i32
    return %c0_i32, %c0_i32_0 : i32, i32
  }
  func.func @transform_4(%arg0: i32) -> (i32, i32) {
    %c0_i32 = arith.constant 0 : i32
    %c0_i32_0 = arith.constant 0 : i32
    %c0_i32_1 = arith.constant 0 : i32
    return %c0_i32, %c0_i32_0 : i32, i32
  }
  func.func @transform_5(%arg0: i32) -> (i32, i32) {
    %c0_i32 = arith.constant 0 : i32
    %c0_i32_0 = arith.constant 0 : i32
    %c0_i32_1 = arith.constant 0 : i32
    return %c0_i32, %c0_i32_0 : i32, i32
  }
  func.func @transform_6(%arg0: i32) -> (i32, i32) {
    %c0_i32 = arith.constant 0 : i32
    %c0_i32_0 = arith.constant 0 : i32
    %c0_i32_1 = arith.constant 0 : i32
    return %c0_i32, %c0_i32_0 : i32, i32
  }
  func.func @transform_7(%arg0: i32) -> (i32, i32) {
    %c0_i32 = arith.constant 0 : i32
    %c0_i32_0 = arith.constant 0 : i32
    %c0_i32_1 = arith.constant 0 : i32
    return %c0_i32, %c0_i32_0 : i32, i32
  }
  func.func @transform_8(%arg0: i32) -> (i32, i32) {
    %c0_i32 = arith.constant 0 : i32
    %c0_i32_0 = arith.constant 0 : i32
    %c0_i32_1 = arith.constant 0 : i32
    return %c0_i32, %c0_i32_0 : i32, i32
  }
  func.func @transform_9(%arg0: i32) -> (i32, i32) {
    %c0_i32 = arith.constant 0 : i32
    %c0_i32_0 = arith.constant 0 : i32
    %c0_i32_1 = arith.constant 0 : i32
    return %c0_i32, %c0_i32_0 : i32, i32
  }
  func.func @transform_10(%arg0: i32) -> (i32, i32) {
    %c0_i32 = arith.constant 0 : i32
    %c0_i32_0 = arith.constant 0 : i32
    %c0_i32_1 = arith.constant 0 : i32
    return %c0_i32, %c0_i32_0 : i32, i32
  }
  func.func @transform_11(%arg0: i32) -> (i32, i32) {
    %c0_i32 = arith.constant 0 : i32
    %c0_i32_0 = arith.constant 0 : i32
    return %arg0, %c0_i32 : i32, i32
  }
  func.func @transform_12(%arg0: i32) -> (i32, i32) {
    %c0_i32 = arith.constant 0 : i32
    %c0_i32_0 = arith.constant 0 : i32
    return %arg0, %c0_i32 : i32, i32
  }
  func.func @transform_13(%arg0: i32) -> (i32, i32) {
    %c0_i32 = arith.constant 0 : i32
    %c0_i32_0 = arith.constant 0 : i32
    return %arg0, %c0_i32 : i32, i32
  }
}

</mosaic_0001>

<bundles_post_ra>
// kernel: vae_forward.1
= control target key start
LH: loop header
LB: loop body
LE: loop exit
PB: predicated region body
PF: predicated region fallthrough
CT: control target
= control target key end

     0   :  { %19 = vsyncpa [#allocation3], 0  ;;  %s1155_s0 = inlined_call_operand.vmem [shape: bf16[16,128], index: 0, kind: input, shape index: {}]   ;;  %s1156_s1 = inlined_call_operand.vmem [shape: bf16[16,128], index: 1, kind: input, shape index: {}]   ;;  %s1157_s2 = inlined_call_operand.vmem [shape: f32[16,128], index: 2, kind: input, shape index: {}]   ;;  %s1158_s3 = inlined_call_operand.hbm [shape: bf16[128,128], index: 3, kind: input, shape index: {}]   ;;  %s1159_s4 = inlined_call_operand.vmem [shape: f32[1,128], index: 4, kind: input, shape index: {}]   ;;  %s1160_s5 = inlined_call_operand.hbm [shape: bf16[128,256], index: 5, kind: input, shape index: {}]   ;;  %s1161_s6 = inlined_call_operand.vmem [shape: f32[1,256], index: 6, kind: input, shape index: {}]   ;;  %s1162_s7 = inlined_call_operand.hbm [shape: bf16[256,128], index: 7, kind: input, shape index: {}]   ;;  %s1163_s8 = inlined_call_operand.vmem [shape: f32[1,128], index: 8, kind: input, shape index: {}]   ;;  %s1164_s9 = inlined_call_operand.vmem [shape: bf16[128,128], index: 9, kind: input, shape index: {}]   ;;  %s1165_s10 = inlined_call_operand.vmem [shape: f32[1,128], index: 10, kind: input, shape index: {}]   ;;  %s1166_s11 = inlined_call_operand.vmem [shape: f32[16,128], index: 11, kind: output, shape index: {0}]   ;;  %s1167_s12 = inlined_call_operand.vmem [shape: f32[16,128], index: 12, kind: output, shape index: {1}]   ;;  %s1168_s13 = inlined_call_operand.vmem [shape: f32[16,128], index: 13, kind: output, shape index: {2}]  }
   0x1   :  { %20 = vsyncpa [#allocation5], 0  ;;  %s980_s25 = smov [#allocation4]  }
   0x2   :  { %s46_s26 = sshll.u32 %s980_s25, 4  ;;  %s47_s26 = int_to_ptr.vmem [resolvable:$true] %s46_s26 }
   0x3   :  { %s924_s27 = scalar_lea.vmem %s47_s26, 2048  ;;  %p929_p1 = scmp.lt.s32.totalorder %s47_s26, %s47_s26 }
   0x4   :  { %p925_p0 = scmp.ne.s32.totalorder %s47_s26, %s924_s27  ;;  %p930_p2 = scmp.lt.s32.totalorder %s924_s27, %s924_s27 }
   0x6   :  { %p931_p3 = por %p930_p2, %p929_p1 }
   0x8   :  { %p932_p4 = pnand %p931_p3, %p925_p0 }
   0xa   :  { %935 = shalt.err (!%p932_p4)
}
   0xb   :  { %s981_s28 = smov 128   ;;  %s982_s29 = smov 8  }
   0xc   :  { %52 = dma.hbm_to_vmem [thread:$0]  %s1160_s5, 2048, %s47_s26, [#allocation5], %s981_s28, %s981_s28, %s982_s29  }
   0xd   :  { %s983_s15 = smov [#allocation2]  }
   0xe   :  { %s32_s16 = sshll.u32 %s983_s15, 4  ;;  %s33_s16 = int_to_ptr.vmem [resolvable:$true] %s32_s16 }
   0xf   :  { %s944_s17 = scalar_lea.vmem %s33_s16, 1024  ;;  %p949_p6 = scmp.lt.s32.totalorder %s33_s16, %s33_s16 }
  0x10   :  { %p945_p5 = scmp.ne.s32.totalorder %s33_s16, %s944_s17  ;;  %p950_p7 = scmp.lt.s32.totalorder %s944_s17, %s944_s17 }
  0x12   :  { %p951_p8 = por %p950_p7, %p949_p6 }
  0x14   :  { %p952_p9 = pnand %p951_p8, %p945_p5 }
  0x16   :  { %955 = shalt.err (!%p952_p9)
}
  0x17   :  { %s984_s18 = smov 64   ;;  %s985_s19 = smov 4  }
  0x18   :  { %38 = dma.hbm_to_vmem [thread:$0]  %s1158_s3, 1024, %s33_s16, [#allocation3], %s984_s18, %s984_s18, %s985_s19  }
  0x19   :  { %s986_s22 = smov [#allocation6]  }
  0x1a   :  { %s60_s23 = sshll.u32 %s986_s22, 4  ;;  %s61_s23 = int_to_ptr.vmem [resolvable:$true] %s60_s23 }
  0x1b   :  { %s964_s5 = scalar_lea.vmem %s61_s23, 2048  ;;  %p969_p11 = scmp.lt.s32.totalorder %s61_s23, %s61_s23 }
  0x1c   :  { %p965_p10 = scmp.ne.s32.totalorder %s61_s23, %s964_s5  ;;  %p970_p12 = scmp.lt.s32.totalorder %s964_s5, %s964_s5 }
  0x1e   :  { %p971_p13 = por %p970_p12, %p969_p11 }
  0x20   :  { %p972_p0 = pnand %p971_p13, %p965_p10 }
  0x22   :  { %975 = shalt.err (!%p972_p0)
}
  0x23   :  { %66 = dma.hbm_to_vmem [thread:$0]  %s1162_s7, 2048, %s61_s23, [#allocation5], %s984_s18, %s984_s18, %s985_s19  }
  0x24   :  { %976 = dma.done.wait [#allocation3], 1024  }
  0x25   :  { %977 = vsyncadd [#allocation3], 4294966272 }
  0x26   :  { %978 = dma.done.wait [#allocation5], 4096  }
  0x27   :  { %979 = vsyncadd [#allocation5], 4294963200  ;;  %v987_v0 = vmov 0.0   ;;  %vm988_vm0 = vmmov 0   ;;  %v846_v1 = vld [vmem:[#allocation2 + $0x38] sm:$0xff]   ;;  %v847_v2 = vld [vmem:[#allocation2 + $0x30] sm:$0xff]   ;;  %v224_v58 = vlaneseq }
  0x28   :  { %796 = vmatprep.subr.bf16.mxu0 %v987_v0  ;;  %812 = vmatprep.mubr.msk.bf16.mxu0 %vm988_vm0, %v987_v0  ;;  %v848_v3 = vld [vmem:[#allocation2 + $0x28] sm:$0xff]   ;;  %v849_v4 = vld [vmem:[#allocation2 + $0x20] sm:$0xff]   ;;  %v855_v5 = vld [vmem:[#allocation4 + $0x74] ss:$8 sps:$4 sm:$0xff]   ;;  %v989_v26 = vmov 0  }
  0x29   :  { %797 = vmatpush3.bf16.msra.mxu0 %v846_v1  ;;  %v857_v6 = vld [vmem:[#allocation4 + $0x70] ss:$8 sps:$4 sm:$0xff]   ;;  %314 = vmatprep.subr.bf16.mxu1 %v855_v5  ;;  %v858_v7 = vld [vmem:[#allocation4 + $0x64] ss:$8 sps:$4 sm:$0xff]   ;;  %v860_v8 = vld [vmem:[#allocation4 + $0x60] ss:$8 sps:$4 sm:$0xff]  }
  0x2a   :  { %798 = vmatprep.subr.bf16.mxu0 %v987_v0  ;;  %315 = vmatpush1.bf16.msra.mxu1 %v857_v6  ;;  %v861_v9 = vld [vmem:[#allocation4 + $0x54] ss:$8 sps:$4 sm:$0xff]   ;;  %v863_v12 = vld [vmem:[#allocation4 + $0x50] ss:$8 sps:$4 sm:$0xff]   ;;  %v864_v13 = vld [vmem:[#allocation4 + $0x44] ss:$8 sps:$4 sm:$0xff]  }
  0x2b   :  { %316 = vmatprep.subr.bf16.mxu1 %v858_v7  ;;  %v850_v10 = vld [vmem:[#allocation2 + $0x18] sm:$0xff]   ;;  %v851_v11 = vld [vmem:[#allocation2 + $0x10] sm:$0xff]   ;;  %v866_v14 = vld [vmem:[#allocation4 + $0x40] ss:$8 sps:$4 sm:$0xff]   ;;  %346 = vmatprep.mubr.bf16.mxu1 %v989_v26  ;;  %v225_v59 = vshrl.u32 %v224_v58, 7 }
  0x2c   :  { %v867_v15 = vld [vmem:[#allocation4 + $0x34] ss:$8 sps:$4 sm:$0xff]   ;;  %v852_v16 = vld [vmem:[#allocation2 + $0x8] sm:$0xff]   ;;  %v869_v17 = vld [vmem:[#allocation4 + $0x30] ss:$8 sps:$4 sm:$0xff]  }
  0x2d   :  { %799 = vmatpush3.bf16.msra.mxu0 %v847_v2  ;;  %v870_v18 = vld [vmem:[#allocation4 + $0x24] ss:$8 sps:$4 sm:$0xff]   ;;  %v872_v21 = vld [vmem:[#allocation4 + $0x20] ss:$8 sps:$4 sm:$0xff]   ;;  %v873_v22 = vld [vmem:[#allocation4 + $0x14] ss:$8 sps:$4 sm:$0xff]  }
  0x2e   :  { %800 = vmatprep.subr.bf16.mxu0 %v987_v0  ;;  %317 = vmatpush1.bf16.msra.mxu1 %v860_v8  ;;  %v853_v19 = vld [vmem:[#allocation2] sm:$0xff]   ;;  %v875_v23 = vld [vmem:[#allocation4 + $0x10] ss:$8 sps:$4 sm:$0xff]   ;;  %v883_v41 = vld [vmem:[#allocation6 + $0x68] sm:$0xff]   ;;  %v226_v60 = vsub.s32 0, %v225_v59  ;;  %v230_v62 = vsub.s32 1, %v225_v59 }
  0x2f   :  { %318 = vmatprep.subr.bf16.mxu1 %v861_v9  ;;  %v854_v20 = vld [vmem:[%s1155_s0] sm:$0xff]   ;;  %v879_v37 = vld [vmem:[#allocation6 + $0x78] sm:$0xff]   ;;  %v881_v39 = vld [vmem:[#allocation6 + $0x70] sm:$0xff]  }
  0x30   :  { %v876_v24 = vld [vmem:[#allocation4 + $0x4] ss:$8 sps:$4 sm:$0xff]   ;;  %v878_v25 = vld [vmem:[#allocation4] ss:$8 sps:$4 sm:$0xff]   ;;  %v880_v38 = vld [vmem:[#allocation6 + $0x38] sm:$0xff]  }
  0x31   :  { %801 = vmatpush3.bf16.msra.mxu0 %v848_v3  ;;  %v701_v27 = vld [vmem:[%s1159_s4] ss:$0 sm:$0xff]  ;;  %v882_v40 = vld [vmem:[#allocation6 + $0x30] sm:$0xff]   ;;  %v884_v42 = vld [vmem:[#allocation6 + $0x28] sm:$0xff]  }
  0x32   :  { %802 = vmatprep.subr.bf16.mxu0 %v987_v0  ;;  %319 = vmatpush1.bf16.msra.mxu1 %v863_v12  ;;  %v885_v43 = vld [vmem:[#allocation6 + $0x60] sm:$0xff]   ;;  %v887_v45 = vld [vmem:[#allocation6 + $0x58] sm:$0xff]   ;;  %v889_v47 = vld [vmem:[#allocation6 + $0x50] sm:$0xff]  }
  0x33   :  { %320 = vmatprep.subr.bf16.mxu1 %v864_v13  ;;  %v886_v44 = vld [vmem:[#allocation6 + $0x20] sm:$0xff]   ;;  %v888_v46 = vld [vmem:[#allocation6 + $0x18] sm:$0xff]   ;;  %v890_v49 = vld [vmem:[#allocation6 + $0x10] sm:$0xff]  }
  0x34   :  { %v895_v48 = vld [vmem:[%s1156_s1] sm:$0xff]   ;;  %v891_v50 = vld [vmem:[#allocation6 + $0x48] sm:$0xff]   ;;  %v896_v54 = vld [vmem:[%s1164_s9 + $0x38] sm:$0xff]  }
  0x35   :  { %803 = vmatpush3.bf16.msra.mxu0 %v849_v4  ;;  %v892_v51 = vld [vmem:[#allocation6 + $0x8] sm:$0xff]   ;;  %v893_v52 = vld [vmem:[#allocation6 + $0x40] sm:$0xff]   ;;  %v897_v55 = vld [vmem:[%s1164_s9 + $0x30] sm:$0xff]  }
  0x36   :  { %804 = vmatprep.subr.bf16.mxu0 %v987_v0  ;;  %321 = vmatpush1.bf16.msra.mxu1 %v866_v14  ;;  %v894_v53 = vld [vmem:[#allocation6] sm:$0xff]   ;;  %v898_v56 = vld [vmem:[%s1164_s9 + $0x28] sm:$0xff]  }
  0x37   :  { %322 = vmatprep.subr.bf16.mxu1 %v867_v15  ;;  %v899_v57 = vld [vmem:[%s1164_s9 + $0x20] sm:$0xff]  }
  0x38   :  { %v222_v61 = vld [vmem:[%s1161_s6] sm:$0x3] }
  0x39   :  { %805 = vmatpush3.bf16.msra.mxu0 %v850_v10  ;;  %v227_v63 = vrot.slane %v222_v61, %v226_v60  ;;  %v231_v1 = vrot.slane %v222_v61, %v230_v62  ;;  %v363_v15 = vld [vmem:[%s1157_s2] sm:$0xff] }
  0x3a   :  { %806 = vmatprep.subr.bf16.mxu0 %v987_v0  ;;  %323 = vmatpush1.bf16.msra.mxu1 %v869_v17  ;;  %v903_v26 = vld [vmem:[%s1164_s9] sm:$0xff]  }
  0x3b   :  { %324 = vmatprep.subr.bf16.mxu1 %v870_v18 }
  0x3d   :  { %807 = vmatpush3.bf16.msra.mxu0 %v851_v11 }
  0x3e   :  { %808 = vmatprep.subr.bf16.mxu0 %v987_v0  ;;  %325 = vmatpush1.bf16.msra.mxu1 %v872_v21 }
  0x3f   :  { %326 = vmatprep.subr.bf16.mxu1 %v873_v22 }
  0x41   :  { %809 = vmatpush3.bf16.msra.mxu0 %v852_v16  ;;  %v364_v16 = vld [vmem:[%s1157_s2 + $0x8] sm:$0xff] }
  0x42   :  { %810 = vmatprep.subr.bf16.mxu0 %v987_v0  ;;  %327 = vmatpush1.bf16.msra.mxu1 %v875_v23  ;;  %v900_v23 = vld [vmem:[%s1164_s9 + $0x18] sm:$0xff]  }
  0x43   :  { %328 = vmatprep.subr.bf16.mxu1 %v876_v24  ;;  %v901_v24 = vld [vmem:[%s1164_s9 + $0x10] sm:$0xff]  }
  0x45   :  { %811 = vmatpush3.bf16.msra.mxu0 %v853_v19 }
  0x46   :  { %329 = vmatpush1.bf16.msra.mxu1 %v878_v25  ;;  %765 = vmatprep.subr.bf16.mxu0 %v879_v37  ;;  %v902_v25 = vld [vmem:[%s1164_s9 + $0x8] sm:$0xff]  }
  0x47   :  { %816 = vmatprep.subr.bf16.mxu1 %v987_v0 }
  0x48   :  { %813 = vmatmul.mubr.bf16.vlgmr.msra.gmra.mxu0 %v854_v20 }
  0x49   :  { %766 = vmatpush3.bf16.msra.mxu0 %v880_v38  ;;  %545 = vmatprep.mubr.bf16.mxu0 %v895_v48  ;;  %v745_v38 = vld [vmem:[%s1165_s10] ss:$0 sm:$0xff] }
  0x4a   :  { %767 = vmatprep.subr.bf16.mxu0 %v881_v39 }
  0x4d   :  { %768 = vmatpush3.bf16.msra.mxu0 %v882_v40 }
  0x4e   :  { %769 = vmatprep.subr.bf16.mxu0 %v883_v41 }
  0x51   :  { %770 = vmatpush3.bf16.msra.mxu0 %v884_v42 }
  0x52   :  { %771 = vmatprep.subr.bf16.mxu0 %v885_v43 }
  0x55   :  { %772 = vmatpush3.bf16.msra.mxu0 %v886_v44 }
  0x56   :  { %773 = vmatprep.subr.bf16.mxu0 %v887_v45 }
  0x59   :  { %774 = vmatpush3.bf16.msra.mxu0 %v888_v46 }
  0x5a   :  { %775 = vmatprep.subr.bf16.mxu0 %v889_v47 }
  0x5d   :  { %776 = vmatpush3.bf16.msra.mxu0 %v890_v49 }
  0x5e   :  { %777 = vmatprep.subr.bf16.mxu0 %v891_v50 }
  0x61   :  { %778 = vmatpush3.bf16.msra.mxu0 %v892_v51 }
  0x62   :  { %779 = vmatprep.subr.bf16.mxu0 %v893_v52 }
  0x65   :  { %780 = vmatpush3.bf16.msra.mxu0 %v894_v53 }
 0x108   :  { %v196_v28 = vpop.f32.mrf.mxu0 }
 0x109   :  { %v197_v30 = vadd.f32 %v701_v27, %v196_v28 }
 0x10a   :  { %v814_v29 = vpop.f32.mrf.mxu0 }
 0x10b   :  { %v203_v34 = vmax.f32 %v197_v30, 0.0  ;;  %v728_v30 = vld [vmem:[%s1163_s8] ss:$0 sm:$0xff] }
 0x10c   :  { %v199_v31 = vpop.f32.mrf.mxu0 }
 0x10d   :  { %v200_v32 = vadd.f32 %v701_v27, %v199_v31 }
 0x10e   :  { %v815_v33 = vpop.f32.mrf.mxu0 }
 0x10f   :  { %v204_v35 = vmax.f32 %v200_v32, 0.0 }
 0x111   :  { %v205_v36 = vpack.c.bf16 %v204_v35, %v203_v34 }
 0x113   :  { %347 = vmatmul.mubr.bf16.vlgmr.msra.gmra.mxu1 %v205_v36 }
 0x114   :  { %832 = vmatprep.mubr.msk.bf16.mxu1 %vm988_vm0, %v987_v0  ;;  %817 = vmatpush3.bf16.msra.mxu1 %v896_v54 }
 0x115   :  { %818 = vmatprep.subr.bf16.mxu1 %v987_v0 }
 0x118   :  { %819 = vmatpush3.bf16.msra.mxu1 %v897_v55 }
 0x119   :  { %820 = vmatprep.subr.bf16.mxu1 %v987_v0 }
 0x11c   :  { %821 = vmatpush3.bf16.msra.mxu1 %v898_v56 }
 0x11d   :  { %822 = vmatprep.subr.bf16.mxu1 %v987_v0 }
 0x120   :  { %823 = vmatpush3.bf16.msra.mxu1 %v899_v57 }
 0x121   :  { %824 = vmatprep.subr.bf16.mxu1 %v987_v0 }
 0x124   :  { %825 = vmatpush3.bf16.msra.mxu1 %v900_v23 }
 0x125   :  { %826 = vmatprep.subr.bf16.mxu1 %v987_v0 }
 0x128   :  { %827 = vmatpush3.bf16.msra.mxu1 %v901_v24 }
 0x129   :  { %828 = vmatprep.subr.bf16.mxu1 %v987_v0 }
 0x12c   :  { %829 = vmatpush3.bf16.msra.mxu1 %v902_v25 }
 0x12d   :  { %830 = vmatprep.subr.bf16.mxu1 %v987_v0 }
 0x130   :  { %831 = vmatpush3.bf16.msra.mxu1 %v903_v26 }
 0x1d3   :  { %v348_v2 = vpop.f32.mrf.mxu1 }
 0x1d4   :  { %v349_v3 = vadd.f32 %v348_v2, %v227_v63 }
 0x1d5   :  { %v350_v4 = vpop.f32.mrf.mxu1 }
 0x1d6   :  { %683 = vst [vmem:[%s1167_s12] sm:$0xff] %v349_v3  ;;  %v351_v5 = vadd.f32 %v350_v4, %v231_v1 }
 0x1d7   :  { %v352_v6 = vpop.f32.mrf.mxu1 }
 0x1d8   :  { %v357_v7 = vmul.f32 0.5, %v351_v5  ;;  %685 = vst [vmem:[%s1168_s13] sm:$0xff] %v351_v5  ;;  %v353_v8 = vadd.f32 %v352_v6, %v227_v63 }
 0x1d9   :  { %v354_v9 = vpop.f32.mrf.mxu1 }
 0x1da   :  { %v359_v10 = vmul.f32 1.442695, %v357_v7  ;;  %684 = vst [vmem:[%s1167_s12 + $0x8] sm:$0xff] %v353_v8  ;;  %v355_v11 = vadd.f32 %v354_v9, %v231_v1 }
 0x1dc   :  { %904 = vpow2.f32 %v359_v10  ;;  %v358_v12 = vmul.f32 0.5, %v355_v11  ;;  %686 = vst [vmem:[%s1168_s13 + $0x8] sm:$0xff] %v355_v11 }
 0x1de   :  { %v361_v13 = vmul.f32 1.442695, %v358_v12 }
 0x1e0   :  { %906 = vpow2.f32 %v361_v13 }
 0x1e9   :  { %v905_v14 = vpop.eup %904 }
 0x1ea   :  { %v365_v17 = vmul.f32 %v905_v14, %v363_v15 }
 0x1ec   :  { %v367_v20 = vadd.f32 %v365_v17, %v349_v3 }
 0x1ed   :  { %v907_v18 = vpop.eup %906 }
 0x1ee   :  { %v366_v19 = vmul.f32 %v907_v18, %v364_v16 }
 0x1f0   :  { %v368_v21 = vadd.f32 %v366_v19, %v353_v8 }
 0x1f2   :  { %v369_v22 = vpack.c.bf16 %v368_v21, %v367_v20 }
 0x1f4   :  { %546 = vmatmul.mubr.bf16.vlgmr.msra.gmra.mxu0 %v369_v22 }
 0x2b4   :  { %v781_v27 = vpop.f32.mrf.mxu0 }
 0x2b6   :  { %v782_v28 = vpop.f32.mrf.mxu0 }
 0x2b7   :  { %v783_v29 = vadd.f32 %v782_v28, %v781_v27 }
 0x2b8   :  { %v784_v31 = vpop.f32.mrf.mxu0 }
 0x2b9   :  { %v548_v33 = vadd.f32 %v783_v29, %v728_v30 }
 0x2ba   :  { %v785_v32 = vpop.f32.mrf.mxu0 }
 0x2bb   :  { %v786_v34 = vadd.f32 %v785_v32, %v784_v31  ;;  %v554_v36 = vmax.f32 %v548_v33, 0.0 }
 0x2bd   :  { %v551_v35 = vadd.f32 %v786_v34, %v728_v30 }
 0x2bf   :  { %v555_v37 = vmax.f32 %v551_v35, 0.0 }
 0x2c1   :  { %v556_v0 = vpack.c.bf16 %v555_v37, %v554_v36 }
 0x2c3   :  { %833 = vmatmul.mubr.bf16.vlgmr.msra.gmra.mxu1 %v556_v0 }
 0x383   :  { %v662_v39 = vpop.f32.mrf.mxu1 }
 0x384   :  { %v663_v40 = vadd.f32 %v745_v38, %v662_v39 }
 0x385   :  { %v834_v41 = vpop.f32.mrf.mxu1 }
 0x386   :  { %v754_v42 = vmul.f32 -1.442695, %v663_v40 }
 0x387   :  { %v665_v43 = vpop.f32.mrf.mxu1 }
 0x388   :  { %908 = vpow2.f32 %v754_v42  ;;  %v666_v44 = vadd.f32 %v745_v38, %v665_v43 }
 0x389   :  { %v835_v45 = vpop.f32.mrf.mxu1 }
 0x38a   :  { %v755_v46 = vmul.f32 -1.442695, %v666_v44 }
 0x38c   :  { %910 = vpow2.f32 %v755_v46 }
 0x395   :  { %v909_v47 = vpop.eup %908 }
 0x396   :  { %v675_v48 = vadd.f32 1.0, %v909_v47 }
 0x398   :  { %912 = vrcp.f32 %v675_v48 }
 0x399   :  { %v911_v49 = vpop.eup %910 }
 0x39a   :  { %v676_v50 = vadd.f32 1.0, %v911_v49 }
 0x39c   :  { %914 = vrcp.f32 %v676_v50 }
 0x3a5   :  { %v913_v51 = vpop.eup %912 }
 0x3a6   :  { %681 = vst [vmem:[%s1166_s11] sm:$0xff] %v913_v51 }
 0x3a9   :  { %v915_v52 = vpop.eup %914 }
 0x3aa   :  { %682 = vst [vmem:[%s1166_s11 + $0x8] sm:$0xff] %v915_v52 }
 0x3ab   :  { %699 = vsyncpa [#allocation3], 1 }
 0x3ac   :  { %700 = vsyncpa [#allocation5], 1 }

</bundles_post_ra>
